<compile_context>
chip_gen: v7x
topology: tpu7x:2x2x1
jax: 0.10.0
libtpu: 0.0.40
codegen_flags: <defaults>
</compile_context>

<pallas_src>
import math

import jax
import jax.numpy as jnp
from jax.experimental import pallas as pl
from jax.experimental.pallas import tpu as pltpu

HIDDEN = 256  # fixed by the module: nn.Linear(inp, 256); nn.Linear(256, out)


def _gnn_mp_kernel(x_ref, w1_ref, b1_ref, w2_ref, b2_ref, out_ref):
    # layer 1: [tb, D] @ [D, 256] -> [tb, 256]   (bf16 MXU inputs, f32 accum)
    h = jnp.dot(x_ref[...], w1_ref[...],
                preferred_element_type=jnp.float32) + b1_ref[...]
    h = jnp.maximum(h, 0.0)

    # layer 2: [tb, 256] @ [256, OUT] -> [tb, OUT]
    o = jnp.dot(h.astype(jnp.bfloat16), w2_ref[...],
                preferred_element_type=jnp.float32) + b2_ref[...]
    out_ref[...] = jnp.maximum(o, 0.0).astype(out_ref.dtype)


def _choose_batch_tile(B, block_b):
    """Pick the batch tile: as large as block_b, but keep >=2 grid steps when
    the batch is big enough so both v7x TensorCores get work."""
    if B > block_b:
        return block_b
    if B >= 32:
        # split into two steps; multiple of 16 so bf16 sublane packing is clean
        return ((B + 1) // 2 + 15) // 16 * 16
    # tiny batch: single step, block covers the whole (unpadded) batch dim
    return B


def gnn_message_passing_forward(x, params, *, block_b=1024, out_dtype=jnp.float32):
    """relu(linear2(relu(linear1(x)))) — matches GnnMessagePassing.forward."""
    w1, b1, w2, b2 = params
    B, D = x.shape
    H = w1.shape[1]
    OUT = w2.shape[1]

    # bf16 weights + activations: native MXU input dtype, halves the DMA bytes.
    w1_bf = w1.astype(jnp.bfloat16)
    w2_bf = w2.astype(jnp.bfloat16)
    x_in = x.astype(jnp.bfloat16)

    tb = _choose_batch_tile(B, block_b)
    n_blocks = pl.cdiv(B, tb)  # ragged last block: Pallas masks the writeback

    # VMEM budget derived from the live tiles (double-buffered activation/output
    # streams + f32 hidden intermediate + resident weights), 2x headroom,
    # clamped to [16, 32] MiB — safe on v5e/v6e (128 MiB) and v7x (64 MiB/TC).
    out_bytes = jnp.dtype(out_dtype).itemsize
    vmem_need = (
        2 * tb * max(D, 128) * 2          # x tile (lane-padded), 2 buffers, bf16
        + 2 * tb * OUT * out_bytes        # out tile, 2 buffers
        + tb * H * 4                      # f32 hidden intermediate
        + (D * H + H * OUT) * 2           # resident bf16 weights
        + (H + OUT) * 4                   # biases
    )
    vmem_limit = int(min(32 << 20, max(16 << 20, 2 * vmem_need)))

    out = pl.pallas_call(
        _gnn_mp_kernel,
        out_shape=jax.ShapeDtypeStruct((B, OUT), out_dtype),
        grid=(n_blocks,),
        in_specs=[
            pl.BlockSpec((tb, D), lambda i: (i, 0)),    # activation stream (bf16)
            pl.BlockSpec((D, H), lambda i: (0, 0)),     # weights stay VMEM-resident
            pl.BlockSpec((1, H), lambda i: (0, 0)),
            pl.BlockSpec((H, OUT), lambda i: (0, 0)),
            pl.BlockSpec((1, OUT), lambda i: (0, 0)),
        ],
        out_specs=pl.BlockSpec((tb, OUT), lambda i: (i, 0)),
        compiler_params=pltpu.CompilerParams(
            dimension_semantics=("parallel",),   # megacore-shard the batch axis
            vmem_limit_bytes=vmem_limit,
        ),
    )(x_in, w1_bf, b1, w2_bf, b2)

    return out


def xavier_uniform(key, fan_in, fan_out, gain=1.0):
    """torch.nn.init.xavier_uniform_ equivalent; returned as [in, out]."""
    limit = gain * math.sqrt(6.0 / (fan_in + fan_out))
    return jax.random.uniform(key, (fan_in, fan_out), jnp.float32, -limit, limit)


def init_params(key, in_dim, out_dim):
    k1, k2 = jax.random.split(key)
    w1 = xavier_uniform(k1, in_dim, HIDDEN)
    b1 = jnp.zeros((1, HIDDEN), jnp.float32)
    w2 = xavier_uniform(k2, HIDDEN, out_dim)
    b2 = jnp.zeros((1, out_dim), jnp.float32)
    return (w1, b1, w2, b2)


def reference_forward_bf16(x, params):
    """Pure-JAX mirror of the kernel math (same bf16 weight/activation casts)."""
    w1, b1, w2, b2 = params
    h = jnp.maximum(
        jnp.dot(x.astype(jnp.bfloat16), w1.astype(jnp.bfloat16),
                preferred_element_type=jnp.float32) + b1, 0.0)
    o = jnp.maximum(
        jnp.dot(h.astype(jnp.bfloat16), w2.astype(jnp.bfloat16),
                preferred_element_type=jnp.float32) + b2, 0.0)
    return o


def reference_forward_f32(x, params):
    """True f32 reference matching the PyTorch module exactly."""
    w1, b1, w2, b2 = params
    h = jnp.maximum(jnp.dot(x, w1) + b1, 0.0)
    return jnp.maximum(jnp.dot(h, w2) + b2, 0.0)


def _check(x, params, out_dim, name):
    out = gnn_message_passing_forward(x, params)
    jax.block_until_ready(out)
    assert out.shape == (x.shape[0], out_dim), f"{name}: bad shape {out.shape}"
    ref_bf = reference_forward_bf16(x, params)
    ref_f32 = reference_forward_f32(x, params)
    assert jnp.allclose(out, ref_bf, atol=1e-3, rtol=1e-3), f"{name}: bf16-ref mismatch"
    # looser check against the true f32 PyTorch-equivalent reference
    # (bf16 MXU inputs introduce ~1e-2 relative error worst case)
    assert jnp.allclose(out, ref_f32, atol=5e-2, rtol=5e-2), f"{name}: f32-ref mismatch"
    return out


if __name__ == "__main__":
    # GnnMessagePassing(inp=16, out=128); hidden is fixed at 256 by the module.
    in_dim, out_dim = 16, 128

    key = jax.random.PRNGKey(0)
    k_x, k_p, k_x2, k_x3 = jax.random.split(key, 4)
    params = init_params(k_p, in_dim, out_dim)

    # small batch: single grid step, block == full batch dim
    x_small = jax.random.normal(k_x, (8, in_dim), jnp.float32)
    _check(x_small, params, out_dim, "small")

    # larger batch: splits into 2 parallel grid steps of 256 rows
    x_big = jax.random.normal(k_x2, (512, in_dim), jnp.float32)
    _check(x_big, params, out_dim, "big")

    # ragged batch: 2 grid steps, last block partially out of bounds (masked)
    x_ragged = jax.random.normal(k_x3, (300, in_dim), jnp.float32)
    _check(x_ragged, params, out_dim, "ragged")

    print("KERNEL_OK")
</pallas_src>

<mosaic_0001>
module attributes {stable_mosaic.version = 11 : i64} {
  func.func @_gnn_mp_kernel(%arg0: i32, %arg1: memref<8x16xbf16, #tpu.memory_space<vmem>>, %arg2: memref<16x256xbf16, #tpu.memory_space<vmem>>, %arg3: memref<1x256xf32, #tpu.memory_space<vmem>>, %arg4: memref<256x128xbf16, #tpu.memory_space<vmem>>, %arg5: memref<1x128xf32, #tpu.memory_space<vmem>>, %arg6: memref<8x128xf32, #tpu.memory_space<vmem>>) attributes {dimension_semantics = [#tpu.dimension_semantics<parallel>], iteration_bounds = array<i64: 1>, scalar_prefetch = 0 : i64, scratch_operands = 0 : i64, tpu.core_type = #tpu.core_type<tc>, window_params = [{transform_indices = @transform_0, window_bounds = array<i64: 8, 16>}, {pipeline_mode = #tpu.pipeline_mode<synchronous>, transform_indices = @transform_1, window_bounds = array<i64: 16, 256>}, {pipeline_mode = #tpu.pipeline_mode<synchronous>, transform_indices = @transform_2, window_bounds = array<i64: 1, 256>}, {pipeline_mode = #tpu.pipeline_mode<synchronous>, transform_indices = @transform_3, window_bounds = array<i64: 256, 128>}, {pipeline_mode = #tpu.pipeline_mode<synchronous>, transform_indices = @transform_4, window_bounds = array<i64: 1, 128>}, {transform_indices = @transform_5, window_bounds = array<i64: 8, 128>}]} {
    %c0 = arith.constant 0 : index
    %c0_0 = arith.constant 0 : index
    %0 = vector.load %arg1[%c0, %c0_0] : memref<8x16xbf16, #tpu.memory_space<vmem>>, vector<8x16xbf16>
    %c0_1 = arith.constant 0 : index
    %c0_2 = arith.constant 0 : index
    %1 = vector.load %arg2[%c0_1, %c0_2] : memref<16x256xbf16, #tpu.memory_space<vmem>>, vector<16x256xbf16>
    %cst = arith.constant dense<0.000000e+00> : vector<8x256xf32>
    %2 = tpu.matmul %0, %1, %cst {dimension_numbers = #tpu.dot_dimension_numbers<[1], [0], [0], [1], [0, 0, 1, 1], [], []>} : vector<8x16xbf16>, vector<16x256xbf16>, vector<8x256xf32> -> vector<8x256xf32>
    %c0_3 = arith.constant 0 : index
    %c0_4 = arith.constant 0 : index
    %3 = vector.load %arg3[%c0_3, %c0_4] : memref<1x256xf32, #tpu.memory_space<vmem>>, vector<1x256xf32>
    %4 = vector.broadcast %3 : vector<1x256xf32> to vector<8x256xf32>
    %5 = arith.addf %2, %4 : vector<8x256xf32>
    %cst_5 = arith.constant 0.000000e+00 : f32
    %6 = vector.broadcast %cst_5 : f32 to vector<8x256xf32>
    %7 = arith.maximumf %5, %6 : vector<8x256xf32>
    %8 = arith.truncf %7 : vector<8x256xf32> to vector<8x256xbf16>
    %c0_6 = arith.constant 0 : index
    %c0_7 = arith.constant 0 : index
    %9 = vector.load %arg4[%c0_6, %c0_7] : memref<256x128xbf16, #tpu.memory_space<vmem>>, vector<256x128xbf16>
    %cst_8 = arith.constant dense<0.000000e+00> : vector<8x128xf32>
    %10 = tpu.matmul %8, %9, %cst_8 {dimension_numbers = #tpu.dot_dimension_numbers<[1], [0], [0], [1], [0, 0, 1, 1], [], []>} : vector<8x256xbf16>, vector<256x128xbf16>, vector<8x128xf32> -> vector<8x128xf32>
    %c0_9 = arith.constant 0 : index
    %c0_10 = arith.constant 0 : index
    %11 = vector.load %arg5[%c0_9, %c0_10] : memref<1x128xf32, #tpu.memory_space<vmem>>, vector<1x128xf32>
    %12 = vector.broadcast %11 : vector<1x128xf32> to vector<8x128xf32>
    %13 = arith.addf %10, %12 : vector<8x128xf32>
    %cst_11 = arith.constant 0.000000e+00 : f32
    %14 = vector.broadcast %cst_11 : f32 to vector<8x128xf32>
    %15 = arith.maximumf %13, %14 : vector<8x128xf32>
    %c0_12 = arith.constant 0 : index
    %c0_13 = arith.constant 0 : index
    %16 = vector.load %arg6[%c0_12, %c0_13] : memref<8x128xf32, #tpu.memory_space<vmem>>, vector<8x128xf32>
    tpu.vector_store %arg6[%c0_12, %c0_13], %15 {strides = array<i32>} : memref<8x128xf32, #tpu.memory_space<vmem>>, vector<8x128xf32>,
    return
  }
  func.func @transform_0(%arg0: i32) -> (i32, i32) {
    %c0_i32 = arith.constant 0 : i32
    %c0_i32_0 = arith.constant 0 : i32
    return %arg0, %c0_i32 : i32, i32
  }
  func.func @transform_1(%arg0: i32) -> (i32, i32) {
    %c0_i32 = arith.constant 0 : i32
    %c0_i32_0 = arith.constant 0 : i32
    %c0_i32_1 = arith.constant 0 : i32
    return %c0_i32, %c0_i32_0 : i32, i32
  }
  func.func @transform_2(%arg0: i32) -> (i32, i32) {
    %c0_i32 = arith.constant 0 : i32
    %c0_i32_0 = arith.constant 0 : i32
    %c0_i32_1 = arith.constant 0 : i32
    return %c0_i32, %c0_i32_0 : i32, i32
  }
  func.func @transform_3(%arg0: i32) -> (i32, i32) {
    %c0_i32 = arith.constant 0 : i32
    %c0_i32_0 = arith.constant 0 : i32
    %c0_i32_1 = arith.constant 0 : i32
    return %c0_i32, %c0_i32_0 : i32, i32
  }
  func.func @transform_4(%arg0: i32) -> (i32, i32) {
    %c0_i32 = arith.constant 0 : i32
    %c0_i32_0 = arith.constant 0 : i32
    %c0_i32_1 = arith.constant 0 : i32
    return %c0_i32, %c0_i32_0 : i32, i32
  }
  func.func @transform_5(%arg0: i32) -> (i32, i32) {
    %c0_i32 = arith.constant 0 : i32
    %c0_i32_0 = arith.constant 0 : i32
    return %arg0, %c0_i32 : i32, i32
  }
}

</mosaic_0001>

<bundles_post_ra>
// kernel: tpu_custom_call.1
= control target key start
LH: loop header
LB: loop body
LE: loop exit
PB: predicated region body
PF: predicated region fallthrough
CT: control target
= control target key end

     0   :  { %10 = vsyncpa [#allocation3], 0  ;;  %s585_s0 = inlined_call_operand.hbm [shape: bf16[8,16], index: 0, kind: input, shape index: {}]   ;;  %s586_s1 = inlined_call_operand.hbm [shape: bf16[16,256], index: 1, kind: input, shape index: {}]   ;;  %s587_s2 = inlined_call_operand.vmem [shape: f32[1,256], index: 2, kind: input, shape index: {}]   ;;  %s588_s3 = inlined_call_operand.hbm [shape: bf16[256,128], index: 3, kind: input, shape index: {}]   ;;  %s589_s4 = inlined_call_operand.vmem [shape: f32[1,128], index: 4, kind: input, shape index: {}]   ;;  %s590_s5 = inlined_call_operand.hbm [shape: f32[8,128], index: 5, kind: output, shape index: {}]  }
   0x1   :  { %11 = vsyncpa [#allocation6], 0 }
   0x2   :  { %12 = vsyncpa [#allocation4], 0  ;;  %s492_s18 = smov [#allocation5]   ;;  %s398_s22 = scalar_lea.hbm %s586_s1, 256 }
   0x3   :  { %s28_s19 = sshll.u32 %s492_s18, 4  ;;  %p399_p0 = scmp.ne.s32.totalorder %s586_s1, %s398_s22  ;;  %s29_s19 = int_to_ptr.vmem [resolvable:$true] %s28_s19 }
   0x4   :  { %p402_p1 = scmp.lt.u32.totalorder %s398_s22, %s586_s1 }
   0x6   :  { %p404_p2 = pnand %p402_p1, %p399_p0 }
   0x8   :  { %407 = shalt.err (!%p404_p2)
}
   0x9   :  { %s408_s27 = scalar_lea.vmem %s29_s19, 256  ;;  %p413_p4 = scmp.lt.s32.totalorder %s29_s19, %s29_s19 }
   0xa   :  { %p409_p3 = scmp.ne.s32.totalorder %s29_s19, %s408_s27  ;;  %p414_p5 = scmp.lt.s32.totalorder %s408_s27, %s408_s27 }
   0xc   :  { %p415_p6 = por %p414_p5, %p413_p4 }
   0xe   :  { %p416_p7 = pnand %p415_p6, %p409_p3 }
  0x10   :  { %419 = shalt.err (!%p416_p7)
}
  0x11   :  { %s493_s28 = smov 128   ;;  %s494_s29 = smov 8  }
  0x12   :  { %34 = dma.hbm_to_vmem [thread:$0]  %s586_s1, 256, %s29_s19, [#allocation6], %s493_s28, %s493_s28, %s494_s29  }
  0x13   :  { %s495_s7 = smov [#allocation2]   ;;  %s496_s9 = smov [#allocation7]  }
  0x14   :  { %s19_s8 = sshll.u32 %s495_s7, 4  ;;  %s42_s10 = sshll.u32 %s496_s9, 4  ;;  %s20_s8 = int_to_ptr.vmem [resolvable:$true] %s19_s8  ;;  %s43_s10 = int_to_ptr.vmem [resolvable:$true] %s42_s10 }
  0x15   :  { %s420_s13 = scalar_lea.hbm %s585_s0, 64 }
  0x16   :  { %p421_p8 = scmp.ne.s32.totalorder %s585_s0, %s420_s13  ;;  %p424_p9 = scmp.lt.u32.totalorder %s420_s13, %s585_s0 }
  0x18   :  { %p426_p10 = pnand %p424_p9, %p421_p8 }
  0x1a   :  { %429 = shalt.err (!%p426_p10)
}
  0x1b   :  { %s430_s1 = scalar_lea.vmem %s20_s8, 64  ;;  %p435_p12 = scmp.lt.s32.totalorder %s20_s8, %s20_s8 }
  0x1c   :  { %p431_p11 = scmp.ne.s32.totalorder %s20_s8, %s430_s1  ;;  %p436_p13 = scmp.lt.s32.totalorder %s430_s1, %s430_s1 }
  0x1e   :  { %p437_p0 = por %p436_p13, %p435_p12 }
  0x20   :  { %p438_p1 = pnand %p437_p0, %p431_p11 }
  0x22   :  { %441 = shalt.err (!%p438_p1)
}
  0x23   :  { %22 = dma.hbm_to_vmem [thread:$0]  %s585_s0, 64, %s20_s8, [#allocation3]  }
  0x24   :  { %s442_s22 = scalar_lea.hbm %s588_s3, 2048 }
  0x25   :  { %p443_p2 = scmp.ne.s32.totalorder %s588_s3, %s442_s22  ;;  %p446_p3 = scmp.lt.u32.totalorder %s442_s22, %s588_s3 }
  0x27   :  { %p448_p4 = pnand %p446_p3, %p443_p2 }
  0x29   :  { %451 = shalt.err (!%p448_p4)
}
  0x2a   :  { %s452_s27 = scalar_lea.vmem %s43_s10, 2048  ;;  %p457_p6 = scmp.lt.s32.totalorder %s43_s10, %s43_s10 }
  0x2b   :  { %p453_p5 = scmp.ne.s32.totalorder %s43_s10, %s452_s27  ;;  %p458_p7 = scmp.lt.s32.totalorder %s452_s27, %s452_s27 }
  0x2d   :  { %p459_p8 = por %p458_p7, %p457_p6 }
  0x2f   :  { %p460_p9 = pnand %p459_p8, %p453_p5 }
  0x31   :  { %463 = shalt.err (!%p460_p9)
}
  0x32   :  { %s497_s0 = smov 64   ;;  %s498_s28 = smov 4  }
  0x33   :  { %48 = dma.hbm_to_vmem [thread:$0]  %s588_s3, 2048, %s43_s10, [#allocation6], %s497_s0, %s497_s0, %s498_s28  }
  0x34   :  { %486 = dma.done.wait [#allocation3], 64  }
  0x35   :  { %487 = vsyncadd [#allocation3], 4294967232 }
  0x36   :  { %488 = dma.done.wait [#allocation6], 2304  }
  0x37   :  { %489 = vsyncadd [#allocation6], 4294964992  ;;  %v499_v0 = vmov 0   ;;  %v379_v1 = vld [vmem:[#allocation5 + $0x4] ss:$8 sps:$4 sm:$0xff]   ;;  %v382_v4 = vld [vmem:[#allocation7 + $0x40] sm:$0xff]   ;;  %v66_v20 = vlaneseq }
  0x38   :  { %122 = vmatprep.mubr.bf16.mxu0 %v499_v0  ;;  %v381_v2 = vld [vmem:[#allocation5] ss:$8 sps:$4 sm:$0xff]   ;;  %v61_v3 = vld [vmem:[#allocation2] sm:$0xf]  ;;  %90 = vmatprep.subr.bf16.mxu0 %v379_v1  ;;  %vm86_vm0 = vcmask 130048   ;;  %v383_v5 = vld [vmem:[#allocation7] sm:$0xff]  }
  0x39   :  { %91 = vmatpush1.bf16.msra.mxu0 %v381_v2  ;;  %348 = vmatprep.subr.bf16.mxu1 %v382_v4  ;;  %v384_v6 = vld [vmem:[#allocation7 + $0x48] sm:$0xff]   ;;  %v386_v8 = vld [vmem:[#allocation7 + $0x50] sm:$0xff]   ;;  %v388_v10 = vld [vmem:[#allocation7 + $0x58] sm:$0xff]   ;;  %v67_v21 = vshrl.u32 %v66_v20, 7 }
  0x3a   :  { %349 = vmatpush3.bf16.msra.mxu1 %v383_v5  ;;  %v385_v7 = vld [vmem:[#allocation7 + $0x8] sm:$0xff]   ;;  %v387_v9 = vld [vmem:[#allocation7 + $0x10] sm:$0xff]   ;;  %v389_v11 = vld [vmem:[#allocation7 + $0x18] sm:$0xff]  }
  0x3b   :  { %350 = vmatprep.subr.bf16.mxu1 %v384_v6  ;;  %v390_v12 = vld [vmem:[#allocation7 + $0x60] sm:$0xff]   ;;  %v392_v14 = vld [vmem:[#allocation7 + $0x68] sm:$0xff]   ;;  %v394_v16 = vld [vmem:[#allocation7 + $0x70] sm:$0xff]   ;;  %v68_v22 = vsub.s32 0, %v67_v21  ;;  %v72_v24 = vsub.s32 1, %v67_v21 }
  0x3c   :  { %330 = vmatmul.mubr.msk.bf16.vlgmr.msra.gmra.mrb[0].mxu0 %vm86_vm0, %v61_v3  ;;  %v391_v13 = vld [vmem:[#allocation7 + $0x20] sm:$0xff]   ;;  %v393_v15 = vld [vmem:[#allocation7 + $0x28] sm:$0xff]   ;;  %v395_v17 = vld [vmem:[#allocation7 + $0x30] sm:$0xff]  }
  0x3d   :  { %v396_v18 = vld [vmem:[#allocation7 + $0x78] sm:$0xff]   ;;  %v64_v23 = vld [vmem:[%s587_s2] sm:$0x3]  ;;  %s500_s2 = smov [#allocation8]  }
  0x3e   :  { %351 = vmatpush3.bf16.msra.mxu1 %v385_v7  ;;  %v397_v19 = vld [vmem:[#allocation7 + $0x38] sm:$0xff]   ;;  %v69_v25 = vrot.slane %v64_v23, %v68_v22  ;;  %v73_v26 = vrot.slane %v64_v23, %v72_v24  ;;  %v331_v38 = vld [vmem:[%s589_s4] ss:$0 sm:$0xff]  ;;  %s318_s9 = sshll.u32 %s500_s2, 4  ;;  %s319_s9 = int_to_ptr.vmem [resolvable:$true] %s318_s9 }
  0x3f   :  { %352 = vmatprep.subr.bf16.mxu1 %v386_v8  ;;  %s464_s10 = scalar_lea.vmem %s319_s9, 128  ;;  %p469_p11 = scmp.lt.s32.totalorder %s319_s9, %s319_s9 }
  0x40   :  { %p465_p10 = scmp.ne.s32.totalorder %s319_s9, %s464_s10  ;;  %p470_p12 = scmp.lt.s32.totalorder %s464_s10, %s464_s10 }
  0x42   :  { %353 = vmatpush3.bf16.msra.mxu1 %v387_v9  ;;  %p471_p13 = por %p470_p12, %p469_p11 }
  0x43   :  { %354 = vmatprep.subr.bf16.mxu1 %v388_v10 }
  0x44   :  { %p472_p0 = pnand %p471_p13, %p465_p10 }
  0x46   :  { %355 = vmatpush3.bf16.msra.mxu1 %v389_v11 }
  0x47   :  { %356 = vmatprep.subr.bf16.mxu1 %v390_v12 }
  0x4a   :  { %357 = vmatpush3.bf16.msra.mxu1 %v391_v13 }
  0x4b   :  { %358 = vmatprep.subr.bf16.mxu1 %v392_v14 }
  0x4e   :  { %359 = vmatpush3.bf16.msra.mxu1 %v393_v15 }
  0x4f   :  { %360 = vmatprep.subr.bf16.mxu1 %v394_v16 }
  0x52   :  { %361 = vmatpush3.bf16.msra.mxu1 %v395_v17 }
  0x53   :  { %362 = vmatprep.subr.bf16.mxu1 %v396_v18 }
  0x56   :  { %363 = vmatpush3.bf16.msra.mxu1 %v397_v19 }
 0x10f   :  { %v124_v27 = vpop.f32.mrb[0].mxu0 }
 0x110   :  { %v125_v28 = vadd.f32 %v124_v27, %v69_v25  ;;  %v126_v29 = vpop.f32.mrb[1].mxu0 }
 0x111   :  { %v127_v30 = vadd.f32 %v126_v29, %v73_v26  ;;  %v128_v31 = vpop.f32.mrb[2].mxu0 }
 0x112   :  { %v131_v32 = vmax.f32 %v125_v28, 0.0  ;;  %v129_v33 = vpop.f32.mrb[3].mxu0 }
 0x113   :  { %v132_v34 = vmax.f32 %v127_v30, 0.0 }
 0x114   :  { %v133_v36 = vpack.c.bf16 %v131_v32, %v131_v32 }
 0x115   :  { %v134_v35 = vpack.c.bf16 %v132_v34, %v132_v34 }
 0x117   :  { %302 = vmatprep.mubr.bf16.mxu1 %v134_v35 }
 0x118   :  { %303 = vmatmul.mubr.bf16.vlgmr.msra.gmra.mrb[0].mxu1 %v133_v36 }
 0x1eb   :  { %v364_v37 = vpop.f32.mrb[0].mxu1 }
 0x1ec   :  { %v365_v39 = vpop.f32.mrb[1].mxu1 }
 0x1ed   :  { %v366_v40 = vadd.f32 %v365_v39, %v364_v37  ;;  %v367_v41 = vpop.f32.mrb[2].mxu1 }
 0x1ee   :  { %v368_v42 = vpop.f32.mrb[3].mxu1 }
 0x1ef   :  { %v305_v43 = vadd.f32 %v366_v40, %v331_v38 }
 0x1f1   :  { %v310_v44 = vmax.f32 %v305_v43, 0.0 }
 0x1f3   :  { %311 = vst [vmem:[#allocation8] sm:$0xff] %v310_v44 }
 0x1f4   :  { %475 = shalt.err (!%p472_p0)
}
 0x1f5   :  { %s476_s4 = scalar_lea.hbm %s590_s5, 128 }
 0x1f6   :  { %p477_p1 = scmp.ne.s32.totalorder %s590_s5, %s476_s4  ;;  %p480_p2 = scmp.lt.u32.totalorder %s476_s4, %s590_s5 }
 0x1f8   :  { %p482_p3 = pnand %p480_p2, %p477_p1 }
 0x1fa   :  { %485 = shalt.err (!%p482_p3)
}
 0x1fb   :  { %321 = dma.vmem_to_hbm [thread:$0]  %s319_s9, 128, %s590_s5, [#allocation4]  }
 0x1fc   :  { %490 = dma.done.wait [#allocation4], 128  }
 0x1fd   :  { %491 = vsyncadd [#allocation4], 4294967168 }
 0x1fe   :  { %325 = vsyncpa [#allocation3], 1 }
 0x1ff   :  { %326 = vsyncpa [#allocation6], 1 }
 0x200   :  { %327 = vsyncpa [#allocation4], 1 }

</bundles_post_ra>
